<compile_context>
chip_gen: v7x
topology: tpu7x:2x2x1
jax: 0.10.0
libtpu: 0.0.40
codegen_flags: <defaults>
</compile_context>

<pallas_src>
import math

import jax
import jax.numpy as jnp
from jax.experimental import pallas as pl
from jax.experimental.pallas import tpu as pltpu


def _round_up(x, m):
    return ((x + m - 1) // m) * m


def _cdiv(a, b):
    return (a + b - 1) // b


def _vmem_capacity_bytes():
    """Physical VMEM per TensorCore; conservative fallback if the query fails."""
    try:
        info = pltpu.get_tpu_info()
        cap = getattr(info, "vmem_capacity_bytes", None)
        if cap:
            return int(cap)
    except Exception:
        pass
    return 64 * 2**20  # v7x-sized fallback (most conservative)


def _pick_row_tile(m_rows, tm_max=512, tm_min=128, align=128):
    """Row tile: a multiple of `align` in [tm_min, tm_max].

    Prefers >=2 row tiles when the row count allows it (so both TensorCores of a
    megacore / v7x chip get work on the "parallel" grid axis), and keeps the tile
    MXU-aligned (128/256 multiples) so every matmul pass is full.
    """
    tm_max = max(tm_min, (tm_max // align) * align)
    m_al = _round_up(max(m_rows, 1), align)
    if m_al <= tm_min:
        return tm_min
    tm = min(tm_max, m_al)
    n = _cdiv(m_al, tm)
    if n == 1 and m_al >= 2 * align:
        n = 2  # keep both cores busy when there is enough work
    tm = _round_up(_cdiv(m_al, n), align)
    return min(tm, tm_max)


# --------------------------------------------------------------------------------------
# Kernel 1: projection (x @ W + b) with online logsumexp over vocab tiles.
#   outputs: unnormalized logits per (row-tile, vocab-tile) block + per-row-tile lse.
# --------------------------------------------------------------------------------------
def _proj_lse_kernel(x_ref, w_ref, b_ref, logits_out_ref, lse_out_ref, m_ref, l_ref):
    # x_ref: (TM, d_model) bf16   w_ref: (d_model, TV) bf16   b_ref: (1, TV) f32
    # logits_out_ref: (TM, TV)    lse_out_ref: (TM, 1) f32 (resident across vocab axis)
    # m_ref / l_ref: (TM, 1) f32 running max / running sum-of-exp (VMEM scratch)
    j = pl.program_id(1)
    nv = pl.num_programs(1)

    @pl.when(j == 0)
    def _init():
        m_ref[...] = jnp.full(m_ref.shape, -jnp.inf, dtype=jnp.float32)
        l_ref[...] = jnp.zeros(l_ref.shape, dtype=jnp.float32)
        lse_out_ref[...] = jnp.zeros(lse_out_ref.shape, dtype=lse_out_ref.dtype)

    # (TM, TV) logits tile: bf16 operands, f32 accumulation on the MXU; f32 bias add.
    logits = jnp.dot(x_ref[...], w_ref[...], preferred_element_type=jnp.float32)
    logits = logits + b_ref[...]

    # Online logsumexp across vocab tiles.
    m_prev = m_ref[...]
    m_new = jnp.maximum(m_prev, jnp.max(logits, axis=-1, keepdims=True))
    l_ref[...] = l_ref[...] * jnp.exp(m_prev - m_new) + jnp.sum(
        jnp.exp(logits - m_new), axis=-1, keepdims=True)
    m_ref[...] = m_new

    # Stream this vocab tile's unnormalized logits straight out (no VMEM stash).
    logits_out_ref[...] = logits.astype(logits_out_ref.dtype)

    @pl.when(j == nv - 1)
    def _finalize():
        lse_out_ref[...] = (m_ref[...] + jnp.log(l_ref[...])).astype(lse_out_ref.dtype)


# --------------------------------------------------------------------------------------
# Kernel 2: cheap elementwise fixup  log_probs = logits - lse
# --------------------------------------------------------------------------------------
def _logsoftmax_fixup_kernel(logits_ref, lse_ref, o_ref):
    o_ref[...] = (logits_ref[...].astype(jnp.float32)
                  - lse_ref[...].astype(jnp.float32)).astype(o_ref.dtype)


def prepare_generator_params(w, b, *, tv=512, compute_dtype=jnp.bfloat16):
    """Pad the vocab dim to a vocab-tile multiple and cast the weight ONCE.

    Call at model-setup time so the per-call wrapper pays no weight pad/cast
    (the cast alone otherwise costs ~one full weight stream per call).
    Returns (w_prepared, b_prepared, true_vocab).
    """
    vocab = w.shape[1]
    tv = min(max(128, (tv // 128) * 128), _round_up(vocab, 128))
    v_pad = _round_up(vocab, tv)
    if v_pad != vocab:
        w = jnp.pad(w, ((0, 0), (0, v_pad - vocab)))
        b = jnp.pad(b.astype(jnp.float32), ((0, v_pad - vocab),), constant_values=-1e30)
    w_p = w.astype(compute_dtype)
    b_p = b.astype(jnp.float32)
    return w_p, b_p, vocab


def generator_forward(x, w, b, *, vocab=None, tm_max=512, tv_max=512,
                      compute_dtype=jnp.bfloat16, logits_dtype=jnp.float32,
                      out_dtype=jnp.float32):
    """x: (..., d_model), w: (d_model, V_stored), b: (V_stored,) -> (..., vocab) log-probs.

    `vocab` is the true vocab size if `w`/`b` were pre-padded via
    prepare_generator_params (defaults to w.shape[1]).
    """
    orig_shape = x.shape
    d_model = orig_shape[-1]
    v_stored = w.shape[1]
    if vocab is None:
        vocab = v_stored

    x2d = x.reshape(-1, d_model)
    m_rows = x2d.shape[0]

    # ---- tile sizes (128-aligned row tile; lane-dense vocab tile) ----------------------
    tm = _pick_row_tile(m_rows, tm_max=tm_max)
    tv_cap = max(128, (tv_max // 128) * 128)
    tv = min(tv_cap, _round_up(v_stored, 128))
    n_row = _cdiv(m_rows, tm)
    m_pad = n_row * tm
    v_pad = _round_up(v_stored, tv)
    nv = v_pad // tv

    # ---- activations: cast (activation-sized, cheap) + pad rows only if needed ---------
    if x2d.dtype != compute_dtype:
        x2d = x2d.astype(compute_dtype)
    if m_pad != m_rows:
        x2d = jnp.pad(x2d, ((0, m_pad - m_rows), (0, 0)))

    # ---- params: no-ops when prepared via prepare_generator_params ---------------------
    if v_pad != v_stored:
        w = jnp.pad(w, ((0, 0), (0, v_pad - v_stored)))
        b = jnp.pad(b.astype(jnp.float32), ((0, v_pad - v_stored),), constant_values=-1e30)
    if w.dtype != compute_dtype:
        w = w.astype(compute_dtype)
    b2d = b.astype(jnp.float32).reshape(1, v_pad)

    # ---- VMEM budget: footprint is O(tm*tv), independent of vocab ----------------------
    vmem_cap = _vmem_capacity_bytes()
    vmem_budget_cap = min(int(0.80 * vmem_cap), 100 * 2**20)  # ~51 MiB on 64 MiB parts
    bpe_in = int(jnp.dtype(compute_dtype).itemsize)
    bpe_lg = int(jnp.dtype(logits_dtype).itemsize)
    bpe_out = int(jnp.dtype(out_dtype).itemsize)
    est = (2 * tm * d_model * bpe_in        # x tile (double-buffered)
           + 2 * d_model * tv * bpe_in      # weight tile
           + 2 * 8 * tv * 4                 # bias tile (sublane padded)
           + 2 * tm * tv * bpe_lg           # unnormalized-logits output tile
           + 2 * tm * 128 * 4               # lse output tile (lane padded)
           + 2 * tm * 128 * 4)              # m / l scratch
    vmem_limit = int(min(vmem_budget_cap, max(32 * 2**20, int(1.5 * est) + 2 * 2**20)))

    proj_cost = pl.CostEstimate(
        flops=int(2 * m_pad * d_model * v_pad),
        transcendentals=int(m_pad * v_pad),
        bytes_accessed=int(m_pad * d_model * bpe_in
                           + n_row * d_model * v_pad * bpe_in
                           + n_row * v_pad * 4
                           + m_pad * v_pad * bpe_lg
                           + m_pad * 4),
    )

    logits_u, lse = pl.pallas_call(
        _proj_lse_kernel,
        out_shape=(jax.ShapeDtypeStruct((m_pad, v_pad), logits_dtype),
                   jax.ShapeDtypeStruct((m_pad, 1), jnp.float32)),
        grid_spec=pltpu.PrefetchScalarGridSpec(
            num_scalar_prefetch=0,
            grid=(n_row, nv),
            in_specs=[
                pl.BlockSpec((tm, d_model), lambda i, j: (i, 0)),
                pl.BlockSpec((d_model, tv), lambda i, j: (0, j)),
                pl.BlockSpec((1, tv), lambda i, j: (0, j)),
            ],
            out_specs=[
                pl.BlockSpec((tm, tv), lambda i, j: (i, j)),
                pl.BlockSpec((tm, 1), lambda i, j: (i, 0)),
            ],
            scratch_shapes=[
                pltpu.VMEM((tm, 1), jnp.float32),   # running max
                pltpu.VMEM((tm, 1), jnp.float32),   # running sum of exp
            ],
        ),
        compiler_params=pltpu.CompilerParams(
            dimension_semantics=("parallel", "arbitrary"),
            vmem_limit_bytes=vmem_limit,
        ),
        cost_estimate=proj_cost,
    )(x2d, w, b2d)

    fix_cost = pl.CostEstimate(
        flops=int(m_pad * v_pad),
        transcendentals=0,
        bytes_accessed=int(m_pad * v_pad * (bpe_lg + bpe_out) + m_pad * 4),
    )

    out = pl.pallas_call(
        _logsoftmax_fixup_kernel,
        out_shape=jax.ShapeDtypeStruct((m_pad, v_pad), out_dtype),
        grid_spec=pltpu.PrefetchScalarGridSpec(
            num_scalar_prefetch=0,
            grid=(n_row, nv),
            in_specs=[
                pl.BlockSpec((tm, tv), lambda i, j: (i, j)),
                pl.BlockSpec((tm, 1), lambda i, j: (i, 0)),
            ],
            out_specs=pl.BlockSpec((tm, tv), lambda i, j: (i, j)),
        ),
        compiler_params=pltpu.CompilerParams(
            dimension_semantics=("parallel", "parallel"),
            vmem_limit_bytes=vmem_limit,
        ),
        cost_estimate=fix_cost,
    )(logits_u, lse)

    if m_pad != m_rows or v_pad != vocab:
        out = out[:m_rows, :vocab]
    return out.reshape(*orig_shape[:-1], vocab)


if __name__ == "__main__":
    # Small shapes consistent with the module: batch=2, seq=8, d_model=32, vocab=128
    batch, seq, d_model, vocab = 2, 8, 32, 128

    key = jax.random.PRNGKey(0)
    kx, kw, kb = jax.random.split(key, 3)

    x = jax.random.normal(kx, (batch, seq, d_model), dtype=jnp.float32)
    # Deterministic parameter init (mimics nn.Linear's uniform(-1/sqrt(d), 1/sqrt(d)))
    bound = 1.0 / math.sqrt(d_model)
    w = jax.random.uniform(kw, (d_model, vocab), minval=-bound, maxval=bound, dtype=jnp.float32)
    b = jax.random.uniform(kb, (vocab,), minval=-bound, maxval=bound, dtype=jnp.float32)

    # Prepare (pad + cast) the projection params once, outside the per-call path.
    w_p, b_p, vocab_sz = prepare_generator_params(w, b)

    out = generator_forward(x, w_p, b_p, vocab=vocab_sz)
    jax.block_until_ready(out)
    assert out.shape == (batch, seq, vocab)
    assert bool(jnp.all(jnp.isfinite(out)))

    # Reference with matching matmul precision (bf16 operands, f32 accumulation + f32 softmax).
    ref_logits = jnp.dot(x.reshape(-1, d_model).astype(jnp.bfloat16),
                         w.astype(jnp.bfloat16),
                         preferred_element_type=jnp.float32) + b
    ref = jax.nn.log_softmax(ref_logits, axis=-1).reshape(batch, seq, vocab)
    assert jnp.allclose(out, ref, atol=1e-4, rtol=1e-4), float(jnp.max(jnp.abs(out - ref)))

    # Loose check against full-f32 math (difference is only bf16 matmul rounding).
    ref_f32 = jax.nn.log_softmax(x @ w + b, axis=-1)
    assert jnp.allclose(out, ref_f32, atol=5e-2, rtol=5e-2)

    print("KERNEL_OK")
</pallas_src>

<mosaic_0001>
module attributes {stable_mosaic.version = 11 : i64} {
  func.func @_proj_lse_kernel(%arg0: i32, %arg1: i32, %arg2: memref<128x32xbf16, #tpu.memory_space<vmem>>, %arg3: memref<32x128xbf16, #tpu.memory_space<vmem>>, %arg4: memref<1x128xf32, #tpu.memory_space<vmem>>, %arg5: memref<128x128xf32, #tpu.memory_space<vmem>>, %arg6: memref<128x1xf32, #tpu.memory_space<vmem>>, %arg7: memref<128x1xf32, #tpu.memory_space<vmem>>, %arg8: memref<128x1xf32, #tpu.memory_space<vmem>>) attributes {dimension_semantics = [#tpu.dimension_semantics<parallel>, #tpu.dimension_semantics<arbitrary>], iteration_bounds = array<i64: 1, 1>, scalar_prefetch = 0 : i64, scratch_operands = 2 : i64, tpu.core_type = #tpu.core_type<tc>, window_params = [{transform_indices = @transform_0, window_bounds = array<i64: 128, 32>}, {transform_indices = @transform_1, window_bounds = array<i64: 32, 128>}, {transform_indices = @transform_2, window_bounds = array<i64: 1, 128>}, {transform_indices = @transform_3, window_bounds = array<i64: 128, 128>}, {transform_indices = @transform_4, window_bounds = array<i64: 128, 1>}]} {
    %c0_i32 = arith.constant 0 : i32
    %0 = arith.cmpi eq, %arg1, %c0_i32 : i32
    %1 = arith.extui %0 : i1 to i32
    %c0_i32_0 = arith.constant 0 : i32
    %2 = arith.cmpi ne, %1, %c0_i32_0 : i32
    scf.if %2 {
      %cst_20 = arith.constant 0xFF800000 : f32
      %29 = vector.broadcast %cst_20 : f32 to vector<128x1xf32>
      %c0_21 = arith.constant 0 : index
      %c0_22 = arith.constant 0 : index
      %30 = vector.load %arg7[%c0_21, %c0_22] : memref<128x1xf32, #tpu.memory_space<vmem>>, vector<128x1xf32>
      tpu.vector_store %arg7[%c0_21, %c0_22], %29 {strides = array<i32>} : memref<128x1xf32, #tpu.memory_space<vmem>>, vector<128x1xf32>,
      %cst_23 = arith.constant 0.000000e+00 : f32
      %31 = vector.broadcast %cst_23 : f32 to vector<128x1xf32>
      %c0_24 = arith.constant 0 : index
      %c0_25 = arith.constant 0 : index
      %32 = vector.load %arg8[%c0_24, %c0_25] : memref<128x1xf32, #tpu.memory_space<vmem>>, vector<128x1xf32>
      tpu.vector_store %arg8[%c0_24, %c0_25], %31 {strides = array<i32>} : memref<128x1xf32, #tpu.memory_space<vmem>>, vector<128x1xf32>,
      %cst_26 = arith.constant 0.000000e+00 : f32
      %33 = vector.broadcast %cst_26 : f32 to vector<128x1xf32>
      %c0_27 = arith.constant 0 : index
      %c0_28 = arith.constant 0 : index
      %34 = vector.load %arg6[%c0_27, %c0_28] : memref<128x1xf32, #tpu.memory_space<vmem>>, vector<128x1xf32>
      tpu.vector_store %arg6[%c0_27, %c0_28], %33 {strides = array<i32>} : memref<128x1xf32, #tpu.memory_space<vmem>>, vector<128x1xf32>,
    } else {
    }
    %c0 = arith.constant 0 : index
    %c0_1 = arith.constant 0 : index
    %3 = vector.load %arg2[%c0, %c0_1] : memref<128x32xbf16, #tpu.memory_space<vmem>>, vector<128x32xbf16>
    %c0_2 = arith.constant 0 : index
    %c0_3 = arith.constant 0 : index
    %4 = vector.load %arg3[%c0_2, %c0_3] : memref<32x128xbf16, #tpu.memory_space<vmem>>, vector<32x128xbf16>
    %cst = arith.constant dense<0.000000e+00> : vector<128x128xf32>
    %5 = tpu.matmul %3, %4, %cst {dimension_numbers = #tpu.dot_dimension_numbers<[1], [0], [0], [1], [0, 0, 1, 1], [], []>} : vector<128x32xbf16>, vector<32x128xbf16>, vector<128x128xf32> -> vector<128x128xf32>
    %c0_4 = arith.constant 0 : index
    %c0_5 = arith.constant 0 : index
    %6 = vector.load %arg4[%c0_4, %c0_5] : memref<1x128xf32, #tpu.memory_space<vmem>>, vector<1x128xf32>
    %7 = vector.broadcast %6 : vector<1x128xf32> to vector<128x128xf32>
    %8 = arith.addf %5, %7 : vector<128x128xf32>
    %c0_6 = arith.constant 0 : index
    %c0_7 = arith.constant 0 : index
    %9 = vector.load %arg7[%c0_6, %c0_7] : memref<128x1xf32, #tpu.memory_space<vmem>>, vector<128x1xf32>
    %cst_8 = arith.constant dense<0xFF800000> : vector<128xf32>
    %10 = vector.multi_reduction <maximumf>, %8, %cst_8 [1] : vector<128x128xf32> to vector<128xf32>
    %11 = vector.shape_cast %10 : vector<128xf32> to vector<128x1xf32>
    %12 = arith.maximumf %9, %11 : vector<128x1xf32>
    %c0_9 = arith.constant 0 : index
    %c0_10 = arith.constant 0 : index
    %13 = vector.load %arg8[%c0_9, %c0_10] : memref<128x1xf32, #tpu.memory_space<vmem>>, vector<128x1xf32>
    %14 = arith.subf %9, %12 : vector<128x1xf32>
    %15 = math.exp %14 : vector<128x1xf32>
    %16 = arith.mulf %13, %15 : vector<128x1xf32>
    %17 = vector.broadcast %12 : vector<128x1xf32> to vector<128x128xf32>
    %18 = arith.subf %8, %17 : vector<128x128xf32>
    %19 = math.exp %18 : vector<128x128xf32>
    %cst_11 = arith.constant dense<0.000000e+00> : vector<128xf32>
    %20 = vector.multi_reduction <add>, %19, %cst_11 [1] : vector<128x128xf32> to vector<128xf32>
    %21 = vector.shape_cast %20 : vector<128xf32> to vector<128x1xf32>
    %22 = arith.addf %16, %21 : vector<128x1xf32>
    %c0_12 = arith.constant 0 : index
    %c0_13 = arith.constant 0 : index
    %23 = vector.load %arg8[%c0_12, %c0_13] : memref<128x1xf32, #tpu.memory_space<vmem>>, vector<128x1xf32>
    tpu.vector_store %arg8[%c0_12, %c0_13], %22 {strides = array<i32>} : memref<128x1xf32, #tpu.memory_space<vmem>>, vector<128x1xf32>,
    %c0_14 = arith.constant 0 : index
    %c0_15 = arith.constant 0 : index
    %24 = vector.load %arg7[%c0_14, %c0_15] : memref<128x1xf32, #tpu.memory_space<vmem>>, vector<128x1xf32>
    tpu.vector_store %arg7[%c0_14, %c0_15], %12 {strides = array<i32>} : memref<128x1xf32, #tpu.memory_space<vmem>>, vector<128x1xf32>,
    %c0_16 = arith.constant 0 : index
    %c0_17 = arith.constant 0 : index
    %25 = vector.load %arg5[%c0_16, %c0_17] : memref<128x128xf32, #tpu.memory_space<vmem>>, vector<128x128xf32>
    tpu.vector_store %arg5[%c0_16, %c0_17], %8 {strides = array<i32>} : memref<128x128xf32, #tpu.memory_space<vmem>>, vector<128x128xf32>,
    %c0_i32_18 = arith.constant 0 : i32
    %26 = arith.cmpi eq, %arg1, %c0_i32_18 : i32
    %27 = arith.extui %26 : i1 to i32
    %c0_i32_19 = arith.constant 0 : i32
    %28 = arith.cmpi ne, %27, %c0_i32_19 : i32
    scf.if %28 {
      %c0_20 = arith.constant 0 : index
      %c0_21 = arith.constant 0 : index
      %29 = vector.load %arg7[%c0_20, %c0_21] : memref<128x1xf32, #tpu.memory_space<vmem>>, vector<128x1xf32>
      %c0_22 = arith.constant 0 : index
      %c0_23 = arith.constant 0 : index
      %30 = vector.load %arg8[%c0_22, %c0_23] : memref<128x1xf32, #tpu.memory_space<vmem>>, vector<128x1xf32>
      %31 = math.log %30 : vector<128x1xf32>
      %32 = arith.addf %29, %31 : vector<128x1xf32>
      %c0_24 = arith.constant 0 : index
      %c0_25 = arith.constant 0 : index
      %33 = vector.load %arg6[%c0_24, %c0_25] : memref<128x1xf32, #tpu.memory_space<vmem>>, vector<128x1xf32>
      tpu.vector_store %arg6[%c0_24, %c0_25], %32 {strides = array<i32>} : memref<128x1xf32, #tpu.memory_space<vmem>>, vector<128x1xf32>,
    } else {
    }
    return
  }
  func.func @transform_0(%arg0: i32, %arg1: i32) -> (i32, i32) {
    %c0_i32 = arith.constant 0 : i32
    %c0_i32_0 = arith.constant 0 : i32
    return %arg0, %c0_i32 : i32, i32
  }
  func.func @transform_1(%arg0: i32, %arg1: i32) -> (i32, i32) {
    %c0_i32 = arith.constant 0 : i32
    %c0_i32_0 = arith.constant 0 : i32
    return %c0_i32, %arg1 : i32, i32
  }
  func.func @transform_2(%arg0: i32, %arg1: i32) -> (i32, i32) {
    %c0_i32 = arith.constant 0 : i32
    %c0_i32_0 = arith.constant 0 : i32
    return %c0_i32, %arg1 : i32, i32
  }
  func.func @transform_3(%arg0: i32, %arg1: i32) -> (i32, i32) {
    %c0_i32 = arith.constant 0 : i32
    return %arg0, %arg1 : i32, i32
  }
  func.func @transform_4(%arg0: i32, %arg1: i32) -> (i32, i32) {
    %c0_i32 = arith.constant 0 : i32
    %c0_i32_0 = arith.constant 0 : i32
    return %arg0, %c0_i32 : i32, i32
  }
}

</mosaic_0001>

<bundles_post_ra>
// kernel: tpu_custom_call.1
= control target key start
LH: loop header
LB: loop body
LE: loop exit
PB: predicated region body
PF: predicated region fallthrough
CT: control target
= control target key end

     0   :  { %vm150_vm0 = vcmask 261120   ;;  %s1517_s0 = inlined_call_operand.vmem [shape: bf16[128,32], index: 0, kind: input, shape index: {}]   ;;  %s1518_s1 = inlined_call_operand.vmem [shape: bf16[32,128], index: 1, kind: input, shape index: {}]   ;;  %s1519_s2 = inlined_call_operand.vmem [shape: f32[1,128], index: 2, kind: input, shape index: {}]   ;;  %s1520_s3 = inlined_call_operand.hbm [shape: f32[128,128], index: 3, kind: output, shape index: {0}]   ;;  %s1521_s4 = inlined_call_operand.vmem [shape: f32[128,1], index: 4, kind: output, shape index: {1}]  }
   0x1   :  { %v821_v0 = vld [vmem:[%s1518_s1] sm:$0xff]   ;;  %v822_v1 = vld [vmem:[%s1518_s1 + $0x8] sm:$0xff]   ;;  %v827_v6 = vld [vmem:[%s1517_s0 + $0x10] sm:$0xff]  }
   0x2   :  { %789 = vmatprep.subr.bf16.mxu0 %v821_v0  ;;  %809 = vmatprep.subr.bf16.mxu1 %v821_v0  ;;  %v823_v2 = vld [vmem:[%s1517_s0] sm:$0xff]   ;;  %v825_v4 = vld [vmem:[%s1517_s0 + $0x8] sm:$0xff]   ;;  %v829_v7 = vld [vmem:[%s1517_s0 + $0x30] sm:$0xff]  }
   0x3   :  { %790 = vmatpush3.bf16.msra.mxu0 %v821_v0  ;;  %811 = vmatpush3.bf16.msra.mxu1 %v821_v0  ;;  %v824_v3 = vld [vmem:[%s1517_s0 + $0x20] sm:$0xff]   ;;  %v826_v5 = vld [vmem:[%s1517_s0 + $0x28] sm:$0xff]  }
   0x4   :  { %791 = vmatprep.subr.bf16.mxu0 %v822_v1  ;;  %810 = vmatprep.subr.bf16.mxu1 %v822_v1 }
   0x5   :  { %793 = vmatprep.mubr.msk.bf16.mxu0 %vm150_vm0, %v823_v2  ;;  %801 = vmatprep.mubr.msk.bf16.mxu1 %vm150_vm0, %v824_v3 }
   0x7   :  { %792 = vmatpush3.bf16.msra.mxu0 %v822_v1  ;;  %812 = vmatpush3.bf16.msra.mxu1 %v822_v1 }
   0xa   :  { %794 = vmatmul.mubr.msk.bf16.vlgmr.msra.gmra.mrb[0].mxu0 %vm150_vm0, %v825_v4  ;;  %802 = vmatmul.mubr.msk.bf16.vlgmr.msra.gmra.mrb[0].mxu1 %vm150_vm0, %v826_v5 }
   0xb   :  { %10 = vsyncpa [#allocation5], 0  ;;  %797 = vmatprep.mubr.msk.bf16.mxu0 %vm150_vm0, %v827_v6  ;;  %805 = vmatprep.mubr.msk.bf16.mxu1 %vm150_vm0, %v829_v7  ;;  %v828_v8 = vld [vmem:[%s1517_s0 + $0x18] sm:$0xff]   ;;  %v1023_v10 = vld [vmem:[%s1519_s2] ss:$0 sm:$0xff]  ;;  %vm22_vm1 = vcmask 7168  }
   0xc   :  { %v830_v9 = vld [vmem:[%s1517_s0 + $0x38] sm:$0xff]   ;;  %v951_v33 = vmov -inf   ;;  %v952_v44 = vmov 0   ;;  %v953_v45 = vmov 0.0   ;;  %s954_s11 = smov [#allocation4]  }
   0xd   :  { %33 = vst.msk [vmem:[#allocation2 + $0x50] sm:$0xff] %vm22_vm1, %v951_v33  ;;  %23 = vst.msk [vmem:[#allocation2] sm:$0xff] %vm22_vm1, %v951_v33  ;;  %819 = vset.pattern.permute.xlu1 %v952_v44  ;;  %820 = vset.pattern.permute.xlu0 %v952_v44  ;;  %s745_s12 = sshll.u32 %s954_s11, 4  ;;  %s746_s12 = int_to_ptr.vmem [resolvable:$true] %s745_s12 }
   0xe   :  { %24 = vst.msk [vmem:[#allocation2 + $0x8] sm:$0xff] %vm22_vm1, %v951_v33  ;;  %25 = vst.msk [vmem:[#allocation2 + $0x10] sm:$0xff] %vm22_vm1, %v951_v33  ;;  %s927_s13 = scalar_lea.vmem %s746_s12, 2048  ;;  %p932_p1 = scmp.lt.s32.totalorder %s746_s12, %s746_s12 }
   0xf   :  { %26 = vst.msk [vmem:[#allocation2 + $0x18] sm:$0xff] %vm22_vm1, %v951_v33  ;;  %27 = vst.msk [vmem:[#allocation2 + $0x20] sm:$0xff] %vm22_vm1, %v951_v33  ;;  %p928_p0 = scmp.ne.s32.totalorder %s746_s12, %s927_s13  ;;  %p933_p2 = scmp.lt.s32.totalorder %s927_s13, %s927_s13 }
  0x10   :  { %28 = vst.msk [vmem:[#allocation2 + $0x28] sm:$0xff] %vm22_vm1, %v951_v33  ;;  %29 = vst.msk [vmem:[#allocation2 + $0x30] sm:$0xff] %vm22_vm1, %v951_v33 }
  0x11   :  { %30 = vst.msk [vmem:[#allocation2 + $0x38] sm:$0xff] %vm22_vm1, %v951_v33  ;;  %31 = vst.msk [vmem:[#allocation2 + $0x40] sm:$0xff] %vm22_vm1, %v951_v33  ;;  %p934_p3 = por %p933_p2, %p932_p1 }
  0x12   :  { %798 = vmatmul.mubr.msk.bf16.gmra.mrb[4].mxu0 %vm150_vm0, %v828_v8  ;;  %806 = vmatmul.mubr.msk.bf16.gmra.mrb[4].mxu1 %vm150_vm0, %v830_v9  ;;  %32 = vst.msk [vmem:[#allocation2 + $0x48] sm:$0xff] %vm22_vm1, %v951_v33  ;;  %34 = vst.msk [vmem:[#allocation2 + $0x58] sm:$0xff] %vm22_vm1, %v951_v33 }
  0x13   :  { %35 = vst.msk [vmem:[#allocation2 + $0x60] sm:$0xff] %vm22_vm1, %v951_v33  ;;  %36 = vst.msk [vmem:[#allocation2 + $0x68] sm:$0xff] %vm22_vm1, %v951_v33  ;;  %p935_p4 = pnand %p934_p3, %p928_p0 }
  0x14   :  { %37 = vst.msk [vmem:[#allocation2 + $0x70] sm:$0xff] %vm22_vm1, %v951_v33  ;;  %38 = vst.msk [vmem:[#allocation2 + $0x78] sm:$0xff] %vm22_vm1, %v951_v33  ;;  %v1201_v46 = vld [vmem:[#allocation2 + $0x50] sm:$0xff]  ;;  %v1213_v53 = vld [vmem:[#allocation2] sm:$0xff] }
  0x15   :  { %41 = vst.msk [vmem:[#allocation3 + $0x10] sm:$0xff] %vm22_vm1, %v953_v45  ;;  %57 = vst.msk [vmem:[%s1521_s4 + $0x10] sm:$0xff] %vm22_vm1, %v953_v45  ;;  %v1203_v47 = vld [vmem:[#allocation2 + $0x10] sm:$0xff]  ;;  %v1252_v5 = vld [vmem:[#allocation2 + $0x8] sm:$0xff] }
  0x16   :  { %39 = vst.msk [vmem:[#allocation3] sm:$0xff] %vm22_vm1, %v953_v45  ;;  %40 = vst.msk [vmem:[#allocation3 + $0x8] sm:$0xff] %vm22_vm1, %v953_v45  ;;  %v1211_v52 = vld [vmem:[#allocation2 + $0x18] sm:$0xff] }
  0x17   :  { %42 = vst.msk [vmem:[#allocation3 + $0x18] sm:$0xff] %vm22_vm1, %v953_v45  ;;  %43 = vst.msk [vmem:[#allocation3 + $0x20] sm:$0xff] %vm22_vm1, %v953_v45  ;;  %v1309_v44 = vld [vmem:[#allocation2 + $0x28] sm:$0xff] }
  0x18   :  { %44 = vst.msk [vmem:[#allocation3 + $0x28] sm:$0xff] %vm22_vm1, %v953_v45  ;;  %45 = vst.msk [vmem:[#allocation3 + $0x30] sm:$0xff] %vm22_vm1, %v953_v45  ;;  %v1232_v61 = vld [vmem:[#allocation2 + $0x40] sm:$0xff] }
  0x19   :  { %46 = vst.msk [vmem:[#allocation3 + $0x38] sm:$0xff] %vm22_vm1, %v953_v45  ;;  %47 = vst.msk [vmem:[#allocation3 + $0x40] sm:$0xff] %vm22_vm1, %v953_v45  ;;  %v1230_v60 = vld [vmem:[#allocation2 + $0x58] sm:$0xff]  ;;  %v1250_v4 = vld [vmem:[#allocation2 + $0x48] sm:$0xff] }
  0x1a   :  { %48 = vst.msk [vmem:[#allocation3 + $0x48] sm:$0xff] %vm22_vm1, %v953_v45  ;;  %49 = vst.msk [vmem:[#allocation3 + $0x50] sm:$0xff] %vm22_vm1, %v953_v45 }
  0x1b   :  { %50 = vst.msk [vmem:[#allocation3 + $0x58] sm:$0xff] %vm22_vm1, %v953_v45  ;;  %51 = vst.msk [vmem:[#allocation3 + $0x60] sm:$0xff] %vm22_vm1, %v953_v45 }
  0x1c   :  { %52 = vst.msk [vmem:[#allocation3 + $0x68] sm:$0xff] %vm22_vm1, %v953_v45  ;;  %53 = vst.msk [vmem:[#allocation3 + $0x70] sm:$0xff] %vm22_vm1, %v953_v45 }
  0x1d   :  { %54 = vst.msk [vmem:[#allocation3 + $0x78] sm:$0xff] %vm22_vm1, %v953_v45  ;;  %55 = vst.msk [vmem:[%s1521_s4] sm:$0xff] %vm22_vm1, %v953_v45 }
  0x1e   :  { %56 = vst.msk [vmem:[%s1521_s4 + $0x8] sm:$0xff] %vm22_vm1, %v953_v45  ;;  %58 = vst.msk [vmem:[%s1521_s4 + $0x18] sm:$0xff] %vm22_vm1, %v953_v45 }
  0x1f   :  { %59 = vst.msk [vmem:[%s1521_s4 + $0x20] sm:$0xff] %vm22_vm1, %v953_v45  ;;  %60 = vst.msk [vmem:[%s1521_s4 + $0x28] sm:$0xff] %vm22_vm1, %v953_v45 }
  0x20   :  { %61 = vst.msk [vmem:[%s1521_s4 + $0x30] sm:$0xff] %vm22_vm1, %v953_v45  ;;  %62 = vst.msk [vmem:[%s1521_s4 + $0x38] sm:$0xff] %vm22_vm1, %v953_v45 }
  0x21   :  { %63 = vst.msk [vmem:[%s1521_s4 + $0x40] sm:$0xff] %vm22_vm1, %v953_v45  ;;  %64 = vst.msk [vmem:[%s1521_s4 + $0x48] sm:$0xff] %vm22_vm1, %v953_v45 }
  0x22   :  { %65 = vst.msk [vmem:[%s1521_s4 + $0x50] sm:$0xff] %vm22_vm1, %v953_v45  ;;  %66 = vst.msk [vmem:[%s1521_s4 + $0x58] sm:$0xff] %vm22_vm1, %v953_v45 }
  0x23   :  { %67 = vst.msk [vmem:[%s1521_s4 + $0x60] sm:$0xff] %vm22_vm1, %v953_v45  ;;  %68 = vst.msk [vmem:[%s1521_s4 + $0x68] sm:$0xff] %vm22_vm1, %v953_v45 }
  0x24   :  { %69 = vst.msk [vmem:[%s1521_s4 + $0x70] sm:$0xff] %vm22_vm1, %v953_v45  ;;  %70 = vst.msk [vmem:[%s1521_s4 + $0x78] sm:$0xff] %vm22_vm1, %v953_v45  ;;  %v1311_v45 = vld [vmem:[#allocation2 + $0x60] sm:$0xff] }
  0xdd   :  { %v795_v11 = vpop.f32.mrb[0].mxu0  ;;  %v803_v12 = vpop.f32.mrb[0].mxu1 }
  0xde   :  { %v1026_v13 = vadd.f32 %v795_v11, %v1023_v10  ;;  %v1029_v14 = vadd.f32 %v803_v12, %v1023_v10  ;;  %v209_v15 = vpop.f32.mrb[1].mxu0  ;;  %v241_v16 = vpop.f32.mrb[1].mxu1  ;;  %v1270_v12 = vld [vmem:[#allocation2 + $0x38] sm:$0xff] }
  0xdf   :  { %v1032_v17 = vadd.f32 %v1023_v10, %v209_v15  ;;  %v1035_v18 = vadd.f32 %v1023_v10, %v241_v16  ;;  %v796_v19 = vpop.f32.mrb[2].mxu0  ;;  %v804_v20 = vpop.f32.mrb[2].mxu1  ;;  %v1272_v15 = vld [vmem:[#allocation2 + $0x30] sm:$0xff] }
  0xe0   :  { %627 = vst [vmem:[#allocation4 + $0x10] sm:$0xff] %v1026_v13  ;;  %635 = vst [vmem:[#allocation4 + $0x50] sm:$0xff] %v1029_v14  ;;  %v1040_v21 = vadd.f32 %v796_v19, %v1023_v10  ;;  %v1043_v22 = vadd.f32 %v804_v20, %v1023_v10  ;;  %308 = vmax.xlane.f32.xlu0 %v1029_v14  ;;  %v244_v23 = vpop.f32.mrb[3].mxu1  ;;  %292 = vmax.xlane.f32.xlu1 %v1026_v13  ;;  %v212_v24 = vpop.f32.mrb[3].mxu0 }
  0xe1   :  { %625 = vst [vmem:[#allocation4] sm:$0xff] %v1032_v17  ;;  %633 = vst [vmem:[#allocation4 + $0x40] sm:$0xff] %v1035_v18  ;;  %v1050_v25 = vadd.f32 %v1023_v10, %v244_v23  ;;  %v1053_v26 = vadd.f32 %v1023_v10, %v212_v24 }
  0xe2   :  { %628 = vst [vmem:[#allocation4 + $0x18] sm:$0xff] %v1040_v21  ;;  %636 = vst [vmem:[#allocation4 + $0x58] sm:$0xff] %v1043_v22 }
  0xe3   :  { %634 = vst [vmem:[#allocation4 + $0x48] sm:$0xff] %v1050_v25  ;;  %626 = vst [vmem:[#allocation4 + $0x8] sm:$0xff] %v1053_v26 }
  0xe4   :  { %294 = vmax.xlane.f32.xlu1 %v1040_v21  ;;  %288 = vmax.xlane.f32.xlu0 %v1032_v17 }
  0xe5   :  { %v799_v27 = vpop.f32.mrb[4].mxu0  ;;  %v807_v28 = vpop.f32.mrb[4].mxu1 }
  0xe6   :  { %v1062_v29 = vadd.f32 %v799_v27, %v1023_v10  ;;  %v225_v30 = vpop.f32.mrb[5].mxu0  ;;  %v1065_v31 = vadd.f32 %v807_v28, %v1023_v10  ;;  %v257_v32 = vpop.f32.mrb[5].mxu1  ;;  %v1290_v28 = vld [vmem:[#allocation2 + $0x78] sm:$0xff] }
  0xe7   :  { %v1084_v34 = vadd.f32 %v1023_v10, %v225_v30  ;;  %v800_v35 = vpop.f32.mrb[6].mxu0  ;;  %v1087_v36 = vadd.f32 %v1023_v10, %v257_v32  ;;  %v808_v37 = vpop.f32.mrb[6].mxu1  ;;  %v1292_v30 = vld [vmem:[#allocation2 + $0x20] sm:$0xff] }
  0xe8   :  { %310 = vmax.xlane.f32.xlu1 %v1043_v22  ;;  %304 = vmax.xlane.f32.xlu0 %v1035_v18  ;;  %631 = vst [vmem:[#allocation4 + $0x30] sm:$0xff] %v1062_v29  ;;  %v1093_v38 = vadd.f32 %v800_v35, %v1023_v10  ;;  %639 = vst [vmem:[#allocation4 + $0x70] sm:$0xff] %v1065_v31  ;;  %v228_v39 = vpop.f32.mrb[7].mxu0  ;;  %v1097_v40 = vadd.f32 %v808_v37, %v1023_v10  ;;  %v260_v41 = vpop.f32.mrb[7].mxu1 }
  0xe9   :  { %629 = vst [vmem:[#allocation4 + $0x20] sm:$0xff] %v1084_v34  ;;  %637 = vst [vmem:[#allocation4 + $0x60] sm:$0xff] %v1087_v36  ;;  %v1102_v42 = vadd.f32 %v1023_v10, %v228_v39  ;;  %v1105_v43 = vadd.f32 %v1023_v10, %v260_v41 }
  0xea   :  { %632 = vst [vmem:[#allocation4 + $0x38] sm:$0xff] %v1093_v38  ;;  %640 = vst [vmem:[#allocation4 + $0x78] sm:$0xff] %v1097_v40 }
  0xeb   :  { %630 = vst [vmem:[#allocation4 + $0x28] sm:$0xff] %v1102_v42  ;;  %638 = vst [vmem:[#allocation4 + $0x68] sm:$0xff] %v1105_v43 }
  0xec   :  { %306 = vmax.xlane.f32.xlu1 %v1050_v25  ;;  %290 = vmax.xlane.f32.xlu0 %v1053_v26 }
  0xf0   :  { %302 = vmax.xlane.f32.xlu1 %v1093_v38  ;;  %300 = vmax.xlane.f32.xlu0 %v1062_v29 }
  0xf4   :  { %318 = vmax.xlane.f32.xlu1 %v1097_v40  ;;  %296 = vmax.xlane.f32.xlu0 %v1084_v34 }
  0xf8   :  { %298 = vmax.xlane.f32.xlu1 %v1102_v42  ;;  %312 = vmax.xlane.f32.xlu0 %v1087_v36 }
  0xfc   :  { %314 = vmax.xlane.f32.xlu1 %v1105_v43  ;;  %316 = vmax.xlane.f32.xlu0 %v1065_v31 }
 0x16d   :  { %v309_v48 = vpop.xlane.xlu0 %308  ;;  %v293_v49 = vpop.xlane.xlu1 %292 }
 0x16e   :  { %v1206_v50 = vmax.f32 %v1201_v46, %v309_v48  ;;  %v1209_v51 = vmax.f32 %v1203_v47, %v293_v49 }
 0x170   :  { %v362_v54 = vsub.f32 %v1201_v46, %v1206_v50  ;;  %619 = vst.msk [vmem:[#allocation2 + $0x50] sm:$0xff] %vm22_vm1, %v1206_v50  ;;  %v354_v55 = vsub.f32 %v1203_v47, %v1209_v51  ;;  %611 = vst.msk [vmem:[#allocation2 + $0x10] sm:$0xff] %vm22_vm1, %v1209_v51  ;;  %428 = vperm.xlu1 %819, %v1209_v51  }
 0x171   :  { %v295_v56 = vpop.xlane.xlu1 %294  ;;  %v289_v57 = vpop.xlane.xlu0 %288 }
 0x172   :  { %v1225_v58 = vmax.f32 %v1211_v52, %v295_v56  ;;  %v1228_v59 = vmax.f32 %v1213_v53, %v289_v57 }
 0x174   :  { %612 = vst.msk [vmem:[#allocation2 + $0x18] sm:$0xff] %vm22_vm1, %v1225_v58  ;;  %609 = vst.msk [vmem:[#allocation2] sm:$0xff] %vm22_vm1, %v1228_v59  ;;  %468 = vperm.xlu1 %819, %v1206_v50   ;;  %418 = vperm.xlu0 %820, %v1228_v59  }
 0x175   :  { %v311_v0 = vpop.xlane.xlu1 %310  ;;  %v305_v1 = vpop.xlane.xlu0 %304 }
 0x176   :  { %v1245_v2 = vmax.f32 %v1230_v60, %v311_v0  ;;  %v1248_v3 = vmax.f32 %v1232_v61, %v305_v1 }
 0x178   :  { %620 = vst.msk [vmem:[#allocation2 + $0x58] sm:$0xff] %vm22_vm1, %v1245_v2  ;;  %617 = vst.msk [vmem:[#allocation2 + $0x40] sm:$0xff] %vm22_vm1, %v1248_v3  ;;  %458 = vperm.xlu1 %819, %v1248_v3   ;;  %473 = vperm.xlu0 %820, %v1245_v2  }
 0x179   :  { %v307_v8 = vpop.xlane.xlu1 %306  ;;  %v291_v9 = vpop.xlane.xlu0 %290 }
 0x17a   :  { %v1265_v10 = vmax.f32 %v1250_v4, %v307_v8  ;;  %v1268_v11 = vmax.f32 %v1252_v5, %v291_v9  ;;  %v1328_v8 = vld [vmem:[#allocation2 + $0x68] sm:$0xff]  ;;  %v1330_v9 = vld [vmem:[#allocation2 + $0x70] sm:$0xff] }
 0x17c   :  { %618 = vst.msk [vmem:[#allocation2 + $0x48] sm:$0xff] %vm22_vm1, %v1265_v10  ;;  %610 = vst.msk [vmem:[#allocation2 + $0x8] sm:$0xff] %vm22_vm1, %v1268_v11  ;;  %433 = vperm.xlu1 %819, %v1225_v58   ;;  %463 = vperm.xlu0 %820, %v1265_v10  }
 0x17d   :  { %v303_v20 = vpop.xlane.xlu1 %302  ;;  %v301_v23 = vpop.xlane.xlu0 %300 }
 0x17e   :  { %v1285_v24 = vmax.f32 %v1270_v12, %v303_v20  ;;  %v1288_v27 = vmax.f32 %v1272_v15, %v301_v23 }
 0x180   :  { %616 = vst.msk [vmem:[#allocation2 + $0x38] sm:$0xff] %vm22_vm1, %v1285_v24  ;;  %615 = vst.msk [vmem:[#allocation2 + $0x30] sm:$0xff] %vm22_vm1, %v1288_v27  ;;  %423 = vperm.xlu1 %819, %v1268_v11  }
 0x181   :  { %v319_v35 = vpop.xlane.xlu1 %318  ;;  %v297_v37 = vpop.xlane.xlu0 %296 }
 0x182   :  { %v1304_v39 = vmax.f32 %v1290_v28, %v319_v35  ;;  %v1307_v41 = vmax.f32 %v1292_v30, %v297_v37 }
 0x184   :  { %624 = vst.msk [vmem:[#allocation2 + $0x78] sm:$0xff] %vm22_vm1, %v1304_v39  ;;  %613 = vst.msk [vmem:[#allocation2 + $0x20] sm:$0xff] %vm22_vm1, %v1307_v41  ;;  %448 = vperm.xlu1 %819, %v1288_v27  }
 0x185   :  { %v299_v56 = vpop.xlane.xlu1 %298  ;;  %v313_v57 = vpop.xlane.xlu0 %312 }
 0x186   :  { %v1323_v0 = vmax.f32 %v1309_v44, %v299_v56  ;;  %v1326_v1 = vmax.f32 %v1311_v45, %v313_v57 }
 0x188   :  { %614 = vst.msk [vmem:[#allocation2 + $0x28] sm:$0xff] %vm22_vm1, %v1323_v0  ;;  %621 = vst.msk [vmem:[#allocation2 + $0x60] sm:$0xff] %vm22_vm1, %v1326_v1  ;;  %438 = vperm.xlu1 %819, %v1307_v41  }
 0x189   :  { %v315_v35 = vpop.xlane.xlu1 %314  ;;  %v317_v37 = vpop.xlane.xlu0 %316 }
 0x18a   :  { %v1342_v56 = vmax.f32 %v1328_v8, %v315_v35  ;;  %v1345_v57 = vmax.f32 %v1330_v9, %v317_v37 }
 0x18c   :  { %622 = vst.msk [vmem:[#allocation2 + $0x68] sm:$0xff] %vm22_vm1, %v1342_v56  ;;  %623 = vst.msk [vmem:[#allocation2 + $0x70] sm:$0xff] %vm22_vm1, %v1345_v57  ;;  %478 = vperm.xlu1 %819, %v1326_v1   ;;  %483 = vperm.xlu0 %820, %v1342_v56  }
 0x190   :  { %453 = vperm.xlu1 %819, %v1285_v24   ;;  %493 = vperm.xlu0 %820, %v1304_v39  }
 0x194   :  { %443 = vperm.xlu1 %819, %v1323_v0  }
 0x198   :  { %488 = vperm.xlu1 %819, %v1345_v57  }
 0x1ef   :  { %v429_v35 = vpop.permute.xlu1 %428 }
 0x1f0   :  { %v498_v37 = vsub.f32 %v1026_v13, %v429_v35 }
 0x1f2   :  { %v516_v48 = vmul.f32 1.442695, %v498_v37 }
 0x1f3   :  { %v469_v20 = vpop.permute.xlu1 %468  ;;  %v419_v32 = vpop.permute.xlu0 %418 }
 0x1f4   :  { %831 = vpow2.f32 %v516_v48  ;;  %v506_v23 = vsub.f32 %v1029_v14, %v469_v20  ;;  %v496_v49 = vsub.f32 %v1032_v17, %v419_v32 }
 0x1f6   :  { %v532_v33 = vmul.f32 1.442695, %v506_v23  ;;  %v512_v16 = vmul.f32 1.442695, %v496_v49 }
 0x1f7   :  { %v459_v19 = vpop.permute.xlu1 %458  ;;  %v474_v6 = vpop.permute.xlu0 %473 }
 0x1f8   :  { %833 = vpow2.f32 %v532_v33  ;;  %v504_v62 = vsub.f32 %v1035_v18, %v459_v19  ;;  %v507_v63 = vsub.f32 %v1043_v22, %v474_v6 }
 0x1f9   :  { %835 = vpow2.f32 %v512_v16 }
 0x1fa   :  { %v528_v7 = vmul.f32 1.442695, %v504_v62  ;;  %v534_v20 = vmul.f32 1.442695, %v507_v63 }
 0x1fb   :  { %v434_v13 = vpop.permute.xlu1 %433  ;;  %v464_v48 = vpop.permute.xlu0 %463 }
 0x1fc   :  { %837 = vpow2.f32 %v528_v7  ;;  %v499_v35 = vsub.f32 %v1040_v21, %v434_v13  ;;  %v505_v17 = vsub.f32 %v1050_v25, %v464_v48 }
 0x1fe   :  { %v832_v37 = vpop.eup %831  ;;  %v518_v14 = vmul.f32 1.442695, %v499_v35  ;;  %v530_v22 = vmul.f32 1.442695, %v505_v17 }
 0x1ff   :  { %v424_v32 = vpop.permute.xlu1 %423  ;;  %548 = vadd.xlane.f32.xlu0 %v832_v37 }
 0x200   :  { %839 = vpow2.f32 %v518_v14  ;;  %v497_v33 = vsub.f32 %v1053_v26, %v424_v32 }
 0x201   :  { %841 = vpow2.f32 %v534_v20 }
 0x202   :  { %v834_v18 = vpop.eup %833  ;;  %v514_v16 = vmul.f32 1.442695, %v497_v33 }
 0x203   :  { %v836_v62 = vpop.eup %835  ;;  %v449_v6 = vpop.permute.xlu1 %448  ;;  %564 = vadd.xlane.f32.xlu0 %v834_v18 }
 0x204   :  { %843 = vpow2.f32 %v514_v16  ;;  %v502_v21 = vsub.f32 %v1062_v29, %v449_v6  ;;  %544 = vadd.xlane.f32.xlu1 %v836_v62 }
 0x205   :  { %845 = vpow2.f32 %v530_v22 }
 0x206   :  { %v838_v7 = vpop.eup %837  ;;  %v524_v63 = vmul.f32 1.442695, %v502_v21 }
 0x207   :  { %v439_v25 = vpop.permute.xlu1 %438  ;;  %560 = vadd.xlane.f32.xlu0 %v838_v7 }
 0x208   :  { %847 = vpow2.f32 %v524_v63  ;;  %v500_v19 = vsub.f32 %v1084_v34, %v439_v25 }
 0x20a   :  { %v840_v26 = vpop.eup %839  ;;  %v520_v49 = vmul.f32 1.442695, %v500_v19 }
 0x20b   :  { %v479_v23 = vpop.permute.xlu1 %478  ;;  %550 = vadd.xlane.f32.xlu1 %v840_v26  ;;  %v842_v35 = vpop.eup %841 }
 0x20c   :  { %849 = vpow2.f32 %v520_v49  ;;  %v508_v13 = vsub.f32 %v1087_v36, %v479_v23  ;;  %v484_v29 = vpop.permute.xlu0 %483 }
 0x20d   :  { %v509_v33 = vsub.f32 %v1105_v43, %v484_v29 }
 0x20e   :  { %v844_v48 = vpop.eup %843  ;;  %v536_v37 = vmul.f32 1.442695, %v508_v13 }
 0x20f   :  { %v454_v14 = vpop.permute.xlu1 %453  ;;  %546 = vadd.xlane.f32.xlu0 %v844_v48  ;;  %566 = vadd.xlane.f32.xlu1 %v842_v35  ;;  %v846_v17 = vpop.eup %845  ;;  %v538_v6 = vmul.f32 1.442695, %v509_v33 }
 0x210   :  { %851 = vpow2.f32 %v536_v37  ;;  %v503_v20 = vsub.f32 %v1093_v38, %v454_v14  ;;  %v494_v16 = vpop.permute.xlu0 %493 }
 0x211   :  { %v511_v7 = vsub.f32 %v1097_v40, %v494_v16 }
 0x212   :  { %v848_v32 = vpop.eup %847  ;;  %v526_v34 = vmul.f32 1.442695, %v503_v20 }
 0x213   :  { %v444_v18 = vpop.permute.xlu1 %443  ;;  %556 = vadd.xlane.f32.xlu0 %v848_v32  ;;  %562 = vadd.xlane.f32.xlu1 %v846_v17  ;;  %v542_v43 = vmul.f32 1.442695, %v511_v7 }
 0x214   :  { %853 = vpow2.f32 %v526_v34  ;;  %v501_v36 = vsub.f32 %v1102_v42, %v444_v18 }
 0x216   :  { %v850_v62 = vpop.eup %849  ;;  %v522_v22 = vmul.f32 1.442695, %v501_v36 }
 0x217   :  { %v489_v21 = vpop.permute.xlu1 %488  ;;  %552 = vadd.xlane.f32.xlu0 %v850_v62 }
 0x218   :  { %855 = vpow2.f32 %v522_v22  ;;  %v510_v38 = vsub.f32 %v1065_v31, %v489_v21 }
 0x219   :  { %857 = vpow2.f32 %v538_v6 }
 0x21a   :  { %v852_v63 = vpop.eup %851  ;;  %v540_v25 = vmul.f32 1.442695, %v510_v38 }
 0x21b   :  { %568 = vadd.xlane.f32.xlu0 %v852_v63 }
 0x21c   :  { %859 = vpow2.f32 %v540_v25 }
 0x21d   :  { %861 = vpow2.f32 %v542_v43 }
 0x21e   :  { %v854_v19 = vpop.eup %853 }
 0x21f   :  { %558 = vadd.xlane.f32.xlu1 %v854_v19 }
 0x222   :  { %v856_v42 = vpop.eup %855 }
 0x223   :  { %554 = vadd.xlane.f32.xlu1 %v856_v42  ;;  %v858_v26 = vpop.eup %857 }
 0x226   :  { %v860_v49 = vpop.eup %859 }
 0x227   :  { %572 = vadd.xlane.f32.xlu0 %v860_v49  ;;  %570 = vadd.xlane.f32.xlu1 %v858_v26  ;;  %v862_v23 = vpop.eup %861 }
 0x22b   :  { %574 = vadd.xlane.f32.xlu1 %v862_v23 }
 0x22c   :  { %938 = shalt.err (!%p935_p4)
}
 0x22d   :  { %s939_s16 = scalar_lea.hbm %s1520_s3, 2048 }
 0x22e   :  { %p940_p5 = scmp.ne.s32.totalorder %s1520_s3, %s939_s16  ;;  %p943_p6 = scmp.lt.u32.totalorder %s939_s16, %s1520_s3 }
 0x230   :  { %p945_p7 = pnand %p943_p6, %p940_p5 }
 0x232   :  { %948 = shalt.err (!%p945_p7)
}
 0x233   :  { %s955_s21 = smov 128   ;;  %s956_s22 = smov 8   ;;  %v372_v31 = vmul.f32 1.442695, %v354_v55  ;;  %v388_v40 = vmul.f32 1.442695, %v362_v54  ;;  %v1522_v13 = vsub.f32 %v1213_v53, %v1228_v59  ;;  %v1523_v48 = vsub.f32 %v1232_v61, %v1248_v3 }
 0x234   :  { %751 = dma.vmem_to_hbm [thread:$0]  %s746_s12, 2048, %s1520_s3, [#allocation5], %s955_s21, %s955_s21, %s956_s22   ;;  %v1524_v29 = vsub.f32 %v1211_v52, %v1225_v58  ;;  %v338_v55 = vld [vmem:[#allocation3 + $0x10] sm:$0xff]  ;;  %v1525_v46 = vsub.f32 %v1230_v60, %v1245_v2  ;;  %v1526_v53 = vsub.f32 %v1252_v5, %v1268_v11  ;;  %v1527_v52 = vsub.f32 %v1250_v4, %v1265_v10  ;;  %v336_v32 = vld [vmem:[#allocation3] sm:$0xff]  ;;  %v339_v6 = vld [vmem:[#allocation3 + $0x18] sm:$0xff] }
 0x235   :  { %863 = vpow2.f32 %v372_v31  ;;  %v368_v35 = vmul.f32 1.442695, %v1522_v13  ;;  %v384_v37 = vmul.f32 1.442695, %v1523_v48  ;;  %v346_v14 = vld [vmem:[#allocation3 + $0x50] sm:$0xff]  ;;  %v1528_v60 = vsub.f32 %v1272_v15, %v1288_v27  ;;  %v344_v18 = vld [vmem:[#allocation3 + $0x40] sm:$0xff] }
 0x236   :  { %865 = vpow2.f32 %v388_v40  ;;  %v374_v47 = vmul.f32 1.442695, %v1524_v29  ;;  %v390_v50 = vmul.f32 1.442695, %v1525_v46  ;;  %v370_v54 = vmul.f32 1.442695, %v1526_v53 }
 0x237   :  { %867 = vpow2.f32 %v368_v35  ;;  %v386_v58 = vmul.f32 1.442695, %v1527_v52  ;;  %v380_v2 = vmul.f32 1.442695, %v1528_v60  ;;  %v1529_v4 = vsub.f32 %v1292_v30, %v1307_v41  ;;  %v347_v19 = vld [vmem:[#allocation3 + $0x58] sm:$0xff]  ;;  %v337_v42 = vld [vmem:[#allocation3 + $0x8] sm:$0xff] }
 0x238   :  { %869 = vpow2.f32 %v384_v37  ;;  %v1530_v7 = vsub.f32 %v1311_v45, %v1326_v1  ;;  %v1531_v49 = vsub.f32 %v1270_v12, %v1285_v24  ;;  %v345_v29 = vld [vmem:[#allocation3 + $0x48] sm:$0xff]  ;;  %v1532_v12 = vsub.f32 %v1309_v44, %v1323_v0 }
 0x239   :  { %871 = vpow2.f32 %v374_v47  ;;  %v376_v10 = vmul.f32 1.442695, %v1529_v4  ;;  %v342_v47 = vld [vmem:[#allocation3 + $0x30] sm:$0xff]  ;;  %v1534_v0 = vsub.f32 %v1330_v9, %v1345_v57  ;;  %v1535_v9 = vsub.f32 %v1290_v28, %v1304_v39  ;;  %v343_v39 = vld [vmem:[#allocation3 + $0x38] sm:$0xff] }
 0x23a   :  { %873 = vpow2.f32 %v390_v50  ;;  %v392_v38 = vmul.f32 1.442695, %v1530_v7  ;;  %v382_v23 = vmul.f32 1.442695, %v1531_v49  ;;  %v378_v24 = vmul.f32 1.442695, %v1532_v12 }
 0x23b   :  { %875 = vpow2.f32 %v370_v54  ;;  %v398_v57 = vmul.f32 1.442695, %v1535_v9 }
 0x23c   :  { %877 = vpow2.f32 %v386_v58 }
 0x23d   :  { %879 = vpow2.f32 %v380_v2  ;;  %v646_v2 = vld [vmem:[#allocation2 + $0x10] sm:$0xff] }
 0x23e   :  { %881 = vpow2.f32 %v376_v10 }
 0x23f   :  { %v864_v51 = vpop.eup %863 }
 0x240   :  { %v402_v59 = vmul.f32 %v864_v51, %v338_v55  ;;  %v866_v61 = vpop.eup %865 }
 0x241   :  { %v868_v20 = vpop.eup %867  ;;  %v410_v5 = vmul.f32 %v866_v61, %v346_v14 }
 0x242   :  { %v870_v11 = vpop.eup %869  ;;  %v400_v34 = vmul.f32 %v868_v20, %v336_v32  ;;  %v1533_v20 = vsub.f32 %v1328_v8, %v1342_v56  ;;  %v348_v56 = vld [vmem:[#allocation3 + $0x60] sm:$0xff] }
 0x243   :  { %v408_v15 = vmul.f32 %v870_v11, %v344_v18  ;;  %v872_v27 = vpop.eup %871 }
 0x244   :  { %v874_v25 = vpop.eup %873  ;;  %v403_v30 = vmul.f32 %v872_v27, %v339_v6  ;;  %v394_v52 = vmul.f32 1.442695, %v1533_v20  ;;  %v644_v6 = vld [vmem:[#allocation2] sm:$0xff]  ;;  %v645_v20 = vld [vmem:[#allocation2 + $0x8] sm:$0xff] }
 0x245   :  { %v876_v41 = vpop.eup %875  ;;  %v411_v1 = vmul.f32 %v874_v25, %v347_v19 }
 0x246   :  { %v878_v40 = vpop.eup %877  ;;  %v401_v13 = vmul.f32 %v876_v41, %v337_v42 }
 0x247   :  { %v880_v35 = vpop.eup %879  ;;  %v409_v50 = vmul.f32 %v878_v40, %v345_v29 }
 0x248   :  { %v406_v53 = vmul.f32 %v880_v35, %v342_v47  ;;  %v882_v54 = vpop.eup %881  ;;  %v647_v35 = vld [vmem:[#allocation2 + $0x18] sm:$0xff] }
 0x28c   :  { %v549_v3 = vpop.xlane.xlu0 %548 }
 0x28d   :  { %v578_v17 = vadd.f32 %v549_v3, %v402_v59  ;;  %v340_v3 = vld [vmem:[#allocation3 + $0x20] sm:$0xff] }
 0x28f   :  { %595 = vst.msk [vmem:[#allocation3 + $0x10] sm:$0xff] %vm22_vm1, %v578_v17  ;;  %v396_v17 = vmul.f32 1.442695, %v1534_v0  ;;  %v351_v0 = vld [vmem:[#allocation3 + $0x78] sm:$0xff] }
 0x290   :  { %v565_v33 = vpop.xlane.xlu0 %564 }
 0x291   :  { %v545_v36 = vpop.xlane.xlu1 %544  ;;  %v586_v16 = vadd.f32 %v565_v33, %v410_v5  ;;  %v404_v5 = vmul.f32 %v882_v54, %v340_v3  ;;  %v655_v54 = vld [vmem:[#allocation2 + $0x58] sm:$0xff] }
 0x292   :  { %v576_v62 = vadd.f32 %v545_v36, %v400_v34 }
 0x293   :  { %603 = vst.msk [vmem:[#allocation3 + $0x50] sm:$0xff] %vm22_vm1, %v586_v16 }
 0x294   :  { %593 = vst.msk [vmem:[#allocation3] sm:$0xff] %vm22_vm1, %v576_v62  ;;  %v561_v22 = vpop.xlane.xlu0 %560  ;;  %v654_v62 = vld [vmem:[#allocation2 + $0x50] sm:$0xff] }
 0x295   :  { %v584_v21 = vadd.f32 %v561_v22, %v408_v15 }
 0x296   :  { %v662_v63 = vld [vmem:[#allocation3 + $0x10] sm:$0xff] }
 0x297   :  { %883 = vlog2.f32 %v662_v63  ;;  %601 = vst.msk [vmem:[#allocation3 + $0x40] sm:$0xff] %vm22_vm1, %v584_v21 }
 0x298   :  { %v551_v43 = vpop.xlane.xlu1 %550  ;;  %885 = vpow2.f32 %v392_v38 }
 0x299   :  { %v579_v26 = vadd.f32 %v551_v43, %v403_v30  ;;  %v652_v43 = vld [vmem:[#allocation2 + $0x40] sm:$0xff] }
 0x29a   :  { %v670_v31 = vld [vmem:[#allocation3 + $0x50] sm:$0xff] }
 0x29b   :  { %v660_v45 = vld [vmem:[#allocation3] sm:$0xff]  ;;  %887 = vlog2.f32 %v670_v31  ;;  %596 = vst.msk [vmem:[#allocation3 + $0x18] sm:$0xff] %vm22_vm1, %v579_v26 }
 0x29c   :  { %889 = vlog2.f32 %v660_v45  ;;  %v567_v48 = vpop.xlane.xlu1 %566  ;;  %v547_v37 = vpop.xlane.xlu0 %546 }
 0x29d   :  { %v587_v51 = vadd.f32 %v567_v48, %v411_v1  ;;  %v577_v55 = vadd.f32 %v547_v37, %v401_v13  ;;  %891 = vpow2.f32 %v382_v23  ;;  %v341_v23 = vld [vmem:[#allocation3 + $0x28] sm:$0xff] }
 0x29e   :  { %v668_v46 = vld [vmem:[#allocation3 + $0x40] sm:$0xff] }
 0x29f   :  { %893 = vlog2.f32 %v668_v46  ;;  %604 = vst.msk [vmem:[#allocation3 + $0x58] sm:$0xff] %vm22_vm1, %v587_v51  ;;  %594 = vst.msk [vmem:[#allocation3 + $0x8] sm:$0xff] %vm22_vm1, %v577_v55  ;;  %v349_v51 = vld [vmem:[#allocation3 + $0x68] sm:$0xff]  ;;  %v350_v55 = vld [vmem:[#allocation3 + $0x70] sm:$0xff] }
 0x2a0   :  { %v563_v59 = vpop.xlane.xlu1 %562  ;;  %v557_v61 = vpop.xlane.xlu0 %556  ;;  %895 = vpow2.f32 %v378_v24 }
 0x2a1   :  { %v884_v14 = vpop.eup %883  ;;  %v585_v58 = vadd.f32 %v563_v59, %v409_v50  ;;  %v582_v44 = vadd.f32 %v557_v61, %v406_v53 }
 0x2a2   :  { %v681_v32 = vmul.f32 0.6931472, %v884_v14  ;;  %v663_v60 = vld [vmem:[#allocation3 + $0x18] sm:$0xff]  ;;  %v886_v11 = vpop.eup %885 }
 0x2a3   :  { %897 = vlog2.f32 %v663_v60  ;;  %602 = vst.msk [vmem:[#allocation3 + $0x48] sm:$0xff] %vm22_vm1, %v585_v58  ;;  %599 = vst.msk [vmem:[#allocation3 + $0x30] sm:$0xff] %vm22_vm1, %v582_v44  ;;  %v412_v27 = vmul.f32 %v886_v11, %v348_v56 }
 0x2a4   :  { %v710_v34 = vadd.f32 %v681_v32, %v646_v2  ;;  %v553_v8 = vpop.xlane.xlu0 %552  ;;  %899 = vpow2.f32 %v394_v52 }
 0x2a5   :  { %v888_v33 = vpop.eup %887  ;;  %v580_v18 = vadd.f32 %v553_v8, %v404_v5  ;;  %901 = vpow2.f32 %v396_v17  ;;  %v653_v8 = vld [vmem:[#allocation2 + $0x48] sm:$0xff] }
 0x2a6   :  { %v890_v36 = vpop.eup %889  ;;  %726 = vst.msk [vmem:[%s1521_s4 + $0x10] sm:$0xff] %vm22_vm1, %v710_v34  ;;  %v697_v16 = vmul.f32 0.6931472, %v888_v33  ;;  %v671_v4 = vld [vmem:[#allocation3 + $0x58] sm:$0xff]  ;;  %v661_v10 = vld [vmem:[#allocation3 + $0x8] sm:$0xff] }
 0x2a7   :  { %v677_v15 = vmul.f32 0.6931472, %v890_v36  ;;  %903 = vlog2.f32 %v671_v4  ;;  %597 = vst.msk [vmem:[#allocation3 + $0x20] sm:$0xff] %vm22_vm1, %v580_v18  ;;  %v892_v22 = vpop.eup %891  ;;  %v650_v18 = vld [vmem:[#allocation2 + $0x30] sm:$0xff] }
 0x2a8   :  { %v718_v21 = vadd.f32 %v697_v16, %v654_v62  ;;  %905 = vlog2.f32 %v661_v10  ;;  %v569_v28 = vpop.xlane.xlu0 %568  ;;  %v407_v19 = vmul.f32 %v892_v22, %v343_v39  ;;  %v656_v39 = vld [vmem:[#allocation2 + $0x60] sm:$0xff] }
 0x2a9   :  { %v894_v7 = vpop.eup %893  ;;  %v708_v38 = vadd.f32 %v677_v15, %v644_v6  ;;  %v588_v63 = vadd.f32 %v569_v28, %v412_v27  ;;  %907 = vpow2.f32 %v398_v57  ;;  %v648_v15 = vld [vmem:[#allocation2 + $0x20] sm:$0xff] }
 0x2aa   :  { %734 = vst.msk [vmem:[%s1521_s4 + $0x50] sm:$0xff] %vm22_vm1, %v718_v21  ;;  %v693_v25 = vmul.f32 0.6931472, %v894_v7  ;;  %v669_v30 = vld [vmem:[#allocation3 + $0x48] sm:$0xff]  ;;  %v666_v41 = vld [vmem:[#allocation3 + $0x30] sm:$0xff]  ;;  %v896_v42 = vpop.eup %895 }
 0x2ab   :  { %724 = vst.msk [vmem:[%s1521_s4] sm:$0xff] %vm22_vm1, %v708_v38  ;;  %909 = vlog2.f32 %v669_v30  ;;  %605 = vst.msk [vmem:[#allocation3 + $0x60] sm:$0xff] %vm22_vm1, %v588_v63  ;;  %v405_v48 = vmul.f32 %v896_v42, %v341_v23  ;;  %v651_v30 = vld [vmem:[#allocation2 + $0x38] sm:$0xff]  ;;  %v649_v42 = vld [vmem:[#allocation2 + $0x28] sm:$0xff] }
 0x2ac   :  { %v716_v26 = vadd.f32 %v693_v25, %v652_v43  ;;  %911 = vlog2.f32 %v666_v41  ;;  %v559_v49 = vpop.xlane.xlu1 %558 }
 0x2ad   :  { %v898_v31 = vpop.eup %897  ;;  %v583_v40 = vadd.f32 %v559_v49, %v407_v19 }
 0x2ae   :  { %732 = vst.msk [vmem:[%s1521_s4 + $0x40] sm:$0xff] %vm22_vm1, %v716_v26  ;;  %v683_v45 = vmul.f32 0.6931472, %v898_v31  ;;  %v664_v1 = vld [vmem:[#allocation3 + $0x20] sm:$0xff]  ;;  %v900_v13 = vpop.eup %899 }
 0x2af   :  { %913 = vlog2.f32 %v664_v1  ;;  %600 = vst.msk [vmem:[#allocation3 + $0x38] sm:$0xff] %vm22_vm1, %v583_v40  ;;  %v902_v37 = vpop.eup %901  ;;  %v413_v61 = vmul.f32 %v900_v13, %v349_v51  ;;  %v657_v40 = vld [vmem:[#allocation2 + $0x68] sm:$0xff]  ;;  %v658_v1 = vld [vmem:[#allocation2 + $0x70] sm:$0xff] }
 0x2b0   :  { %v711_v29 = vadd.f32 %v683_v45, %v647_v35  ;;  %v555_v47 = vpop.xlane.xlu1 %554  ;;  %v414_v3 = vmul.f32 %v902_v37, %v350_v55 }
 0x2b1   :  { %v904_v12 = vpop.eup %903  ;;  %v581_v24 = vadd.f32 %v555_v47, %v405_v48 }
 0x2b2   :  { %v906_v46 = vpop.eup %905  ;;  %727 = vst.msk [vmem:[%s1521_s4 + $0x18] sm:$0xff] %vm22_vm1, %v711_v29  ;;  %v699_v50 = vmul.f32 0.6931472, %v904_v12  ;;  %v672_v53 = vld [vmem:[#allocation3 + $0x60] sm:$0xff]  ;;  %v659_v29 = vld [vmem:[#allocation2 + $0x78] sm:$0xff] }
 0x2b3   :  { %v679_v59 = vmul.f32 0.6931472, %v906_v46  ;;  %915 = vlog2.f32 %v672_v53  ;;  %598 = vst.msk [vmem:[#allocation3 + $0x28] sm:$0xff] %vm22_vm1, %v581_v24  ;;  %v908_v14 = vpop.eup %907 }
 0x2b4   :  { %v719_v52 = vadd.f32 %v699_v50, %v655_v54  ;;  %v571_v58 = vpop.xlane.xlu1 %570  ;;  %v573_v44 = vpop.xlane.xlu0 %572  ;;  %v415_v33 = vmul.f32 %v908_v14, %v351_v0 }
 0x2b5   :  { %v910_v17 = vpop.eup %909  ;;  %v709_v32 = vadd.f32 %v679_v59, %v645_v20  ;;  %v589_v60 = vadd.f32 %v571_v58, %v413_v61  ;;  %v590_v2 = vadd.f32 %v573_v44, %v414_v3 }
 0x2b6   :  { %v912_v5 = vpop.eup %911  ;;  %735 = vst.msk [vmem:[%s1521_s4 + $0x58] sm:$0xff] %vm22_vm1, %v719_v52  ;;  %v695_v11 = vmul.f32 0.6931472, %v910_v17  ;;  %v667_v34 = vld [vmem:[#allocation3 + $0x38] sm:$0xff] }
 0x2b7   :  { %725 = vst.msk [vmem:[%s1521_s4 + $0x8] sm:$0xff] %vm22_vm1, %v709_v32  ;;  %v689_v56 = vmul.f32 0.6931472, %v912_v5  ;;  %917 = vlog2.f32 %v667_v34  ;;  %606 = vst.msk [vmem:[#allocation3 + $0x68] sm:$0xff] %vm22_vm1, %v589_v60 }
 0x2b8   :  { %607 = vst.msk [vmem:[#allocation3 + $0x70] sm:$0xff] %vm22_vm1, %v590_v2  ;;  %v717_v36 = vadd.f32 %v695_v11, %v653_v8  ;;  %v575_v9 = vpop.xlane.xlu1 %574 }
 0x2b9   :  { %v914_v57 = vpop.eup %913  ;;  %v714_v16 = vadd.f32 %v689_v56, %v650_v18  ;;  %v591_v4 = vadd.f32 %v575_v9, %v415_v33 }
 0x2ba   :  { %733 = vst.msk [vmem:[%s1521_s4 + $0x48] sm:$0xff] %vm22_vm1, %v717_v36  ;;  %v685_v10 = vmul.f32 0.6931472, %v914_v57  ;;  %v665_v62 = vld [vmem:[#allocation3 + $0x28] sm:$0xff] }
 0x2bb   :  { %730 = vst.msk [vmem:[%s1521_s4 + $0x30] sm:$0xff] %vm22_vm1, %v714_v16  ;;  %919 = vlog2.f32 %v665_v62  ;;  %608 = vst.msk [vmem:[#allocation3 + $0x78] sm:$0xff] %vm22_vm1, %v591_v4 }
 0x2bc   :  { %v712_v27 = vadd.f32 %v685_v10, %v648_v15 }
 0x2bd   :  { %v916_v22 = vpop.eup %915 }
 0x2be   :  { %728 = vst.msk [vmem:[%s1521_s4 + $0x20] sm:$0xff] %vm22_vm1, %v712_v27  ;;  %v701_v6 = vmul.f32 0.6931472, %v916_v22  ;;  %v673_v21 = vld [vmem:[#allocation3 + $0x68] sm:$0xff] }
 0x2bf   :  { %v674_v28 = vld [vmem:[#allocation3 + $0x70] sm:$0xff]  ;;  %921 = vlog2.f32 %v673_v21 }
 0x2c0   :  { %v720_v7 = vadd.f32 %v701_v6, %v656_v39  ;;  %923 = vlog2.f32 %v674_v28 }
 0x2c1   :  { %v918_v38 = vpop.eup %917 }
 0x2c2   :  { %736 = vst.msk [vmem:[%s1521_s4 + $0x60] sm:$0xff] %vm22_vm1, %v720_v7  ;;  %v691_v63 = vmul.f32 0.6931472, %v918_v38  ;;  %v675_v25 = vld [vmem:[#allocation3 + $0x78] sm:$0xff] }
 0x2c3   :  { %925 = vlog2.f32 %v675_v25 }
 0x2c4   :  { %v715_v41 = vadd.f32 %v691_v63, %v651_v30 }
 0x2c5   :  { %v920_v43 = vpop.eup %919 }
 0x2c6   :  { %731 = vst.msk [vmem:[%s1521_s4 + $0x38] sm:$0xff] %vm22_vm1, %v715_v41  ;;  %v687_v19 = vmul.f32 0.6931472, %v920_v43 }
 0x2c8   :  { %v713_v26 = vadd.f32 %v687_v19, %v649_v42 }
 0x2c9   :  { %v922_v49 = vpop.eup %921 }
 0x2ca   :  { %v924_v23 = vpop.eup %923  ;;  %729 = vst.msk [vmem:[%s1521_s4 + $0x28] sm:$0xff] %vm22_vm1, %v713_v26  ;;  %v703_v31 = vmul.f32 0.6931472, %v922_v49 }
 0x2cb   :  { %v705_v45 = vmul.f32 0.6931472, %v924_v23 }
 0x2cc   :  { %v721_v13 = vadd.f32 %v703_v31, %v657_v40 }
 0x2cd   :  { %v926_v35 = vpop.eup %925  ;;  %v722_v48 = vadd.f32 %v705_v45, %v658_v1 }
 0x2ce   :  { %737 = vst.msk [vmem:[%s1521_s4 + $0x68] sm:$0xff] %vm22_vm1, %v721_v13  ;;  %v707_v37 = vmul.f32 0.6931472, %v926_v35 }
 0x2cf   :  { %738 = vst.msk [vmem:[%s1521_s4 + $0x70] sm:$0xff] %vm22_vm1, %v722_v48 }
 0x2d0   :  { %v723_v47 = vadd.f32 %v707_v37, %v659_v29 }
 0x2d2   :  { %739 = vst.msk [vmem:[%s1521_s4 + $0x78] sm:$0xff] %vm22_vm1, %v723_v47 }
 0x2d3   :  { %949 = dma.done.wait [#allocation5], 2048  }
 0x2d4   :  { %950 = vsyncadd [#allocation5], 4294965248 }
 0x2d5   :  { %759 = vsyncpa [#allocation5], 1 }

</bundles_post_ra>
